<compile_context>
chip_gen: v7x
topology: tpu7x:2x2x1
jax: 0.10.0
libtpu: 0.0.40
codegen_flags: <defaults>
</compile_context>

<pallas_src>
import functools

import jax
import jax.numpy as jnp
import numpy as np
from jax import lax
from jax.experimental import pallas as pl
from jax.experimental.pallas import tpu as pltpu


# ---------------------------------------------------------------------------
# In-kernel compute helpers (values already loaded from VMEM refs)
# ---------------------------------------------------------------------------
def _relu(x):
    return jnp.maximum(x, 0.0)


def _conv1x1(x_bf16, w_ref, b_ref):
    # x: (Cin, HW) bf16, w: (Cout, Cin) bf16, b: (Cout, 1) f32 -> (Cout, HW) f32
    return jnp.dot(w_ref[...], x_bf16, preferred_element_type=jnp.float32) + b_ref[...]


def _conv3tap(x_bf16, w_ref, b_ref, shift, keep_lo, keep_hi, hw):
    # Fused 3-tap conv: w_ref is (3*Cout, Cin) with taps stacked along rows.
    # out[i] = t0[i - shift] + t1[i] + t2[i + shift]   (keep_* masks kill the
    # wrapped-around boundary contributions; masks are resident f32 0/1).
    cout = w_ref.shape[0] // 3
    t = jnp.dot(w_ref[...], x_bf16, preferred_element_type=jnp.float32)  # (3*Cout, HW)
    t0 = t[0:cout]
    t1 = t[cout:2 * cout]
    t2 = t[2 * cout:3 * cout]
    y = t1
    y = y + pltpu.roll(t0, shift % hw, 1) * keep_lo
    y = y + pltpu.roll(t2, (-shift) % hw, 1) * keep_hi
    return y + b_ref[...]


# ---------------------------------------------------------------------------
# Fused SqnxtUnit kernel: Bt batch images per grid step.
# ---------------------------------------------------------------------------
def sqnxt_kernel(resize_identity, Bt, W, cr,
                 mask_ref, x_ref,
                 w1_ref, b1_ref, w2_ref, b2_ref, w3_ref, b3_ref,
                 w4_ref, b4_ref, w5_ref, b5_ref,
                 o_ref, *scratch):
    HW = x_ref.shape[-1]
    ident_ref = scratch[0] if resize_identity else None

    # Precomputed boundary keep-masks (resident input, constant index_map).
    keep_nfc = mask_ref[0:1]   # not first column
    keep_nlc = mask_ref[1:2]   # not last column
    keep_nfr = mask_ref[2:3]   # not first row
    keep_nlr = mask_ref[3:4]   # not last row

    def one_image(b, carry):
        x = x_ref[b]                                    # (C1, HW) bf16
        # Fused conv1 (+ identity_conv in the resize path): one MXU matmul,
        # weights were stacked host-side along the output-channel axis.
        t = _relu(_conv1x1(x, w1_ref, b1_ref))          # (cr[+C2], HW) f32
        if resize_identity:
            ident_ref[...] = t[cr:]                     # identity -> f32 VMEM scratch
            y = t[:cr]
        else:
            y = t
        y = _relu(_conv1x1(y.astype(jnp.bfloat16), w2_ref, b2_ref))           # -> cq
        y = _relu(_conv3tap(y.astype(jnp.bfloat16), w3_ref, b3_ref, 1,
                            keep_nfc, keep_nlc, HW))                          # (1,3) conv
        y = _relu(_conv3tap(y.astype(jnp.bfloat16), w4_ref, b4_ref, W,
                            keep_nfr, keep_nlr, HW))                          # (3,1) conv
        y = _relu(_conv1x1(y.astype(jnp.bfloat16), w5_ref, b5_ref))           # -> C2

        identity = ident_ref[...] if resize_identity else x.astype(jnp.float32)
        o_ref[b] = _relu(y + identity).astype(o_ref.dtype)
        return carry

    lax.fori_loop(0, Bt, one_image, None, unroll=True)


# ---------------------------------------------------------------------------
# Host-side weight prepacking: (Cout,Cin) bf16 weights, fused taps, (Cout,1) bias.
# In the resize path conv1 and identity_conv are merged into a single matrix.
# ---------------------------------------------------------------------------
def pack_params(params, resize_identity):
    def w1x1(w):   # (Cin, Cout) -> (Cout, Cin) bf16
        return jnp.asarray(w).T.astype(jnp.bfloat16)

    def wtaps(w):  # (3, Cin, Cout) -> (3*Cout, Cin) bf16, taps stacked on rows
        return jnp.concatenate([w[k].T for k in range(3)], axis=0).astype(jnp.bfloat16)

    def b(bv):     # (1, Cout) -> (Cout, 1) f32
        return jnp.asarray(bv).reshape(-1, 1).astype(jnp.float32)

    p = {
        "w2": w1x1(params["w2"]), "b2": b(params["b2"]),
        "w3": wtaps(params["w3"]), "b3": b(params["b3"]),
        "w4": wtaps(params["w4"]), "b4": b(params["b4"]),
        "w5": w1x1(params["w5"]), "b5": b(params["b5"]),
    }
    if resize_identity:
        # conv1 and identity_conv share RHS x and K=C1: stack into one matmul.
        p["w1"] = jnp.concatenate([w1x1(params["w1"]), w1x1(params["wi"])], axis=0)
        p["b1"] = jnp.concatenate([b(params["b1"]), b(params["bi"])], axis=0)
    else:
        p["w1"] = w1x1(params["w1"])
        p["b1"] = b(params["b1"])
    return p


# ---------------------------------------------------------------------------
# Wrapper: NCHW in / NCHW out (bf16 HBM activations, only free reshapes).
# ---------------------------------------------------------------------------
def _pick_block_batch(B, target=8):
    """Largest divisor of B that is <= target while keeping grid >= 2 steps
    when B >= 2 (so v7x can split the batch across both TensorCores)."""
    best = 1
    for bt in range(1, min(B, target) + 1):
        if B % bt != 0:
            continue
        if B // bt >= 2 or B == 1:
            best = bt
    return best


def sqnxt_unit(x_nchw, p, resize_identity, block_batch=8):
    B, C1, H, W = x_nchw.shape
    HW = H * W
    C2 = p["w5"].shape[0]
    cr = p["w2"].shape[1]
    cq = p["w2"].shape[0]
    if not resize_identity:
        assert C1 == C2, "non-resize path requires c1 == c2"

    Bt = _pick_block_batch(B, block_batch)
    grid = B // Bt

    # bf16 activations in HBM; f32 accumulation / element-wise math in-kernel.
    x = x_nchw.astype(jnp.bfloat16).reshape(B, C1, HW)

    # Boundary keep-masks for the fused (1,3)/(3,1) convs, computed once here
    # and held resident in VMEM (constant index_map -> never re-DMA'd).
    lin = jnp.arange(HW, dtype=jnp.int32)
    col = lin % W
    row = lin // W
    masks = jnp.stack([col != 0, col != (W - 1),
                       row != 0, row != (H - 1)]).astype(jnp.float32)   # (4, HW)

    weight_args = [p["w1"], p["b1"], p["w2"], p["b2"], p["w3"], p["b3"],
                   p["w4"], p["b4"], p["w5"], p["b5"]]
    args = [masks, x] + weight_args

    def full_spec(a):
        nd = a.ndim
        return pl.BlockSpec(a.shape, lambda i, _nd=nd: (0,) * _nd)

    in_specs = ([full_spec(masks),
                 pl.BlockSpec((Bt, C1, HW), lambda i: (i, 0, 0))]
                + [full_spec(a) for a in weight_args])

    scratch_shapes = ([pltpu.VMEM((C2, HW), jnp.float32)]
                      if resize_identity else [])

    # Advisory cost estimate for XLA scheduling around the custom call.
    c1out = p["w1"].shape[0]   # cr (+ C2 when conv1/identity are merged)
    flops_per_img = 2 * HW * (C1 * c1out + cr * cq + cq * 3 * cr
                              + cr * 3 * cr + cr * C2)
    weight_bytes = sum(int(np.prod(a.shape)) * a.dtype.itemsize for a in weight_args)
    act_bytes = (B * C1 * HW + B * C2 * HW) * 2   # bf16 in + out
    cost = pl.CostEstimate(flops=int(B * flops_per_img), transcendentals=0,
                           bytes_accessed=int(act_bytes + weight_bytes
                                              + masks.size * 4))

    # VMEM budget: double-buffered activation blocks + resident weights/masks
    # + identity scratch, with headroom (sized for v7x's smaller VMEM).
    block_bytes = Bt * (C1 + C2) * HW * 2
    vmem_est = (2 * block_bytes + 2 * weight_bytes + 2 * masks.size * 4
                + (C2 * HW * 4 if resize_identity else 0) + (4 << 20))
    vmem_limit = int(min(max(vmem_est, 16 << 20), 32 << 20))

    out = pl.pallas_call(
        functools.partial(sqnxt_kernel, resize_identity, Bt, W, cr),
        grid=(grid,),
        in_specs=in_specs,
        out_specs=pl.BlockSpec((Bt, C2, HW), lambda i: (i, 0, 0)),
        out_shape=jax.ShapeDtypeStruct((B, C2, HW), jnp.bfloat16),
        scratch_shapes=scratch_shapes,
        compiler_params=pltpu.CompilerParams(
            dimension_semantics=("parallel",),
            vmem_limit_bytes=vmem_limit),
        cost_estimate=cost,
    )(*args)

    return out.reshape(B, C2, H, W)


sqnxt_unit_jit = jax.jit(sqnxt_unit, static_argnums=(2,))


# ---------------------------------------------------------------------------
# Deterministic parameter init (ConvBnAct: conv(+bias) -> BN -> ReLU, BN folded)
# ---------------------------------------------------------------------------
def _fold_bn(w, bias, gamma, beta, mean, var, eps=1e-5):
    scale = gamma / jnp.sqrt(var + eps)       # (Cout,)
    w_f = w * scale                           # broadcast over last (Cout) axis
    # Round weights onto the bf16 grid so kernel (bf16 matmul operands) and the
    # f32 reference use numerically identical weights.
    w_f = w_f.astype(jnp.bfloat16).astype(jnp.float32)
    b_f = (bias - mean) * scale + beta
    return w_f, b_f.reshape(1, -1)


def init_params(key, c1, c2, s=1):
    assert s == 1, "only s == 1 implemented"  # TODO(synk): stride-2 variant
    if c1 > c2:
        rd, resize = 4, True
    else:
        rd, resize = 2, False
    cr, cq = c1 // rd, c1 // (2 * rd)

    def conv_bn(k, cin, cout, ktaps=1, has_bias=True):
        kw, kb, kg, kbt, km, kv = jax.random.split(k, 6)
        shape = (ktaps, cin, cout) if ktaps > 1 else (cin, cout)
        w = jax.random.normal(kw, shape, jnp.float32) * np.sqrt(2.0 / (cin * ktaps))
        bias = (0.1 * jax.random.normal(kb, (cout,), jnp.float32)
                if has_bias else jnp.zeros((cout,), jnp.float32))
        gamma = 1.0 + 0.1 * jax.random.normal(kg, (cout,), jnp.float32)
        beta = 0.1 * jax.random.normal(kbt, (cout,), jnp.float32)
        mean = 0.1 * jax.random.normal(km, (cout,), jnp.float32)
        var = 1.0 + 0.1 * jax.random.uniform(kv, (cout,), jnp.float32)
        return _fold_bn(w, bias, gamma, beta, mean, var)

    keys = jax.random.split(key, 6)
    p = {}
    p["w1"], p["b1"] = conv_bn(keys[0], c1, cr, 1, True)    # 1x1, bias
    p["w2"], p["b2"] = conv_bn(keys[1], cr, cq, 1, True)    # 1x1, bias
    p["w3"], p["b3"] = conv_bn(keys[2], cq, cr, 3, False)   # (1,3), pad (0,1)
    p["w4"], p["b4"] = conv_bn(keys[3], cr, cr, 3, False)   # (3,1), pad (1,0)
    p["w5"], p["b5"] = conv_bn(keys[4], cr, c2, 1, True)    # 1x1, bias
    if resize:
        p["wi"], p["bi"] = conv_bn(keys[5], c1, c2, 1, False)  # identity 1x1
    return p, resize


# ---------------------------------------------------------------------------
# Pure-JAX reference (lax conv, f32) for a numerical sanity check
# ---------------------------------------------------------------------------
def sqnxt_ref(x_nchw, p, resize):
    x = jnp.transpose(x_nchw, (0, 2, 3, 1))

    def conv(x, w_hwio, b, pad):
        y = jax.lax.conv_general_dilated(
            x, w_hwio, (1, 1), pad, dimension_numbers=("NHWC", "HWIO", "NHWC"))
        return jax.nn.relu(y + b.reshape(1, 1, 1, -1))

    def c1x1(x, w, b):
        return conv(x, w.reshape(1, 1, *w.shape), b, ((0, 0), (0, 0)))

    identity = c1x1(x, p["wi"], p["bi"]) if resize else x
    y = c1x1(x, p["w1"], p["b1"])
    y = c1x1(y, p["w2"], p["b2"])
    y = conv(y, p["w3"].reshape(1, 3, *p["w3"].shape[1:]), p["b3"], ((0, 0), (1, 1)))
    y = conv(y, p["w4"].reshape(3, 1, *p["w4"].shape[1:]), p["b4"], ((1, 1), (0, 0)))
    y = c1x1(y, p["w5"], p["b5"])
    out = jax.nn.relu(y + identity)
    return jnp.transpose(out, (0, 3, 1, 2))


if __name__ == "__main__":
    key = jax.random.PRNGKey(0)
    kx, kp1, kp2 = jax.random.split(key, 3)

    B, C1, H, W = 2, 32, 16, 16
    x = jax.random.normal(kx, (B, C1, H, W), jnp.float32)
    # Round the input onto the bf16 grid so the kernel (bf16 HBM activations)
    # and the f32 reference consume numerically identical inputs.
    x = x.astype(jnp.bfloat16).astype(jnp.float32)

    # Config A: c1 <= c2  (reduction_den=2, identity = x)
    pA, resizeA = init_params(kp1, C1, 32, s=1)
    outA = sqnxt_unit_jit(x, pack_params(pA, resizeA), resizeA)
    jax.block_until_ready(outA)
    refA = sqnxt_ref(x, pA, resizeA)
    np.testing.assert_allclose(np.asarray(outA.astype(jnp.float32)),
                               np.asarray(refA), rtol=4e-2, atol=4e-2)

    # Config B: c1 > c2  (reduction_den=4, identity via fused 1x1 identity_conv)
    pB, resizeB = init_params(kp2, C1, 16, s=1)
    outB = sqnxt_unit_jit(x, pack_params(pB, resizeB), resizeB)
    jax.block_until_ready(outB)
    refB = sqnxt_ref(x, pB, resizeB)
    np.testing.assert_allclose(np.asarray(outB.astype(jnp.float32)),
                               np.asarray(refB), rtol=4e-2, atol=4e-2)

    print("KERNEL_OK")
</pallas_src>

<mosaic_0001>
module attributes {stable_mosaic.version = 11 : i64} {
  func.func @sqnxt_kernel(%arg0: i32, %arg1: memref<4x256xf32, #tpu.memory_space<vmem>>, %arg2: memref<1x32x256xbf16, #tpu.memory_space<vmem>>, %arg3: memref<16x32xbf16, #tpu.memory_space<vmem>>, %arg4: memref<16x1xf32, #tpu.memory_space<vmem>>, %arg5: memref<8x16xbf16, #tpu.memory_space<vmem>>, %arg6: memref<8x1xf32, #tpu.memory_space<vmem>>, %arg7: memref<48x8xbf16, #tpu.memory_space<vmem>>, %arg8: memref<16x1xf32, #tpu.memory_space<vmem>>, %arg9: memref<48x16xbf16, #tpu.memory_space<vmem>>, %arg10: memref<16x1xf32, #tpu.memory_space<vmem>>, %arg11: memref<32x16xbf16, #tpu.memory_space<vmem>>, %arg12: memref<32x1xf32, #tpu.memory_space<vmem>>, %arg13: memref<1x32x256xbf16, #tpu.memory_space<vmem>>) attributes {dimension_semantics = [#tpu.dimension_semantics<parallel>], iteration_bounds = array<i64: 2>, scalar_prefetch = 0 : i64, scratch_operands = 0 : i64, tpu.core_type = #tpu.core_type<tc>, window_params = [{pipeline_mode = #tpu.pipeline_mode<synchronous>, transform_indices = @transform_0, window_bounds = array<i64: 4, 256>}, {transform_indices = @transform_1, window_bounds = array<i64: 1, 32, 256>}, {pipeline_mode = #tpu.pipeline_mode<synchronous>, transform_indices = @transform_2, window_bounds = array<i64: 16, 32>}, {pipeline_mode = #tpu.pipeline_mode<synchronous>, transform_indices = @transform_3, window_bounds = array<i64: 16, 1>}, {pipeline_mode = #tpu.pipeline_mode<synchronous>, transform_indices = @transform_4, window_bounds = array<i64: 8, 16>}, {pipeline_mode = #tpu.pipeline_mode<synchronous>, transform_indices = @transform_5, window_bounds = array<i64: 8, 1>}, {pipeline_mode = #tpu.pipeline_mode<synchronous>, transform_indices = @transform_6, window_bounds = array<i64: 48, 8>}, {pipeline_mode = #tpu.pipeline_mode<synchronous>, transform_indices = @transform_7, window_bounds = array<i64: 16, 1>}, {pipeline_mode = #tpu.pipeline_mode<synchronous>, transform_indices = @transform_8, window_bounds = array<i64: 48, 16>}, {pipeline_mode = #tpu.pipeline_mode<synchronous>, transform_indices = @transform_9, window_bounds = array<i64: 16, 1>}, {pipeline_mode = #tpu.pipeline_mode<synchronous>, transform_indices = @transform_10, window_bounds = array<i64: 32, 16>}, {pipeline_mode = #tpu.pipeline_mode<synchronous>, transform_indices = @transform_11, window_bounds = array<i64: 32, 1>}, {transform_indices = @transform_12, window_bounds = array<i64: 1, 32, 256>}]} {
    %c0 = arith.constant 0 : index
    %c0_0 = arith.constant 0 : index
    %0 = vector.load %arg1[%c0, %c0_0] : memref<4x256xf32, #tpu.memory_space<vmem>>, vector<1x256xf32>
    %c1 = arith.constant 1 : index
    %c0_1 = arith.constant 0 : index
    %1 = vector.load %arg1[%c1, %c0_1] : memref<4x256xf32, #tpu.memory_space<vmem>>, vector<1x256xf32>
    %c2 = arith.constant 2 : index
    %c0_2 = arith.constant 0 : index
    %2 = vector.load %arg1[%c2, %c0_2] : memref<4x256xf32, #tpu.memory_space<vmem>>, vector<1x256xf32>
    %c3 = arith.constant 3 : index
    %c0_3 = arith.constant 0 : index
    %3 = vector.load %arg1[%c3, %c0_3] : memref<4x256xf32, #tpu.memory_space<vmem>>, vector<1x256xf32>
    %c0_i32 = arith.constant 0 : i32
    %4 = arith.index_cast %c0_i32 : i32 to index
    %c0_4 = arith.constant 0 : index
    %c0_5 = arith.constant 0 : index
    %5 = vector.load %arg2[%4, %c0_4, %c0_5] : memref<1x32x256xbf16, #tpu.memory_space<vmem>>, vector<1x32x256xbf16>
    %6 = vector.shape_cast %5 : vector<1x32x256xbf16> to vector<32x256xbf16>
    %c0_6 = arith.constant 0 : index
    %c0_7 = arith.constant 0 : index
    %7 = vector.load %arg3[%c0_6, %c0_7] : memref<16x32xbf16, #tpu.memory_space<vmem>>, vector<16x32xbf16>
    %cst = arith.constant dense<0.000000e+00> : vector<16x256xf32>
    %8 = tpu.matmul %7, %6, %cst {dimension_numbers = #tpu.dot_dimension_numbers<[1], [0], [0], [1], [0, 0, 1, 1], [], []>} : vector<16x32xbf16>, vector<32x256xbf16>, vector<16x256xf32> -> vector<16x256xf32>
    %c0_8 = arith.constant 0 : index
    %c0_9 = arith.constant 0 : index
    %9 = vector.load %arg4[%c0_8, %c0_9] : memref<16x1xf32, #tpu.memory_space<vmem>>, vector<16x1xf32>
    %10 = vector.broadcast %9 : vector<16x1xf32> to vector<16x256xf32>
    %11 = arith.addf %8, %10 : vector<16x256xf32>
    %cst_10 = arith.constant 0.000000e+00 : f32
    %12 = vector.broadcast %cst_10 : f32 to vector<16x256xf32>
    %13 = arith.maximumf %11, %12 : vector<16x256xf32>
    %14 = arith.truncf %13 : vector<16x256xf32> to vector<16x256xbf16>
    %c0_11 = arith.constant 0 : index
    %c0_12 = arith.constant 0 : index
    %15 = vector.load %arg5[%c0_11, %c0_12] : memref<8x16xbf16, #tpu.memory_space<vmem>>, vector<8x16xbf16>
    %cst_13 = arith.constant dense<0.000000e+00> : vector<8x256xf32>
    %16 = tpu.matmul %15, %14, %cst_13 {dimension_numbers = #tpu.dot_dimension_numbers<[1], [0], [0], [1], [0, 0, 1, 1], [], []>} : vector<8x16xbf16>, vector<16x256xbf16>, vector<8x256xf32> -> vector<8x256xf32>
    %c0_14 = arith.constant 0 : index
    %c0_15 = arith.constant 0 : index
    %17 = vector.load %arg6[%c0_14, %c0_15] : memref<8x1xf32, #tpu.memory_space<vmem>>, vector<8x1xf32>
    %18 = vector.broadcast %17 : vector<8x1xf32> to vector<8x256xf32>
    %19 = arith.addf %16, %18 : vector<8x256xf32>
    %cst_16 = arith.constant 0.000000e+00 : f32
    %20 = vector.broadcast %cst_16 : f32 to vector<8x256xf32>
    %21 = arith.maximumf %19, %20 : vector<8x256xf32>
    %22 = arith.truncf %21 : vector<8x256xf32> to vector<8x256xbf16>
    %c0_17 = arith.constant 0 : index
    %c0_18 = arith.constant 0 : index
    %23 = vector.load %arg7[%c0_17, %c0_18] : memref<48x8xbf16, #tpu.memory_space<vmem>>, vector<48x8xbf16>
    %cst_19 = arith.constant dense<0.000000e+00> : vector<48x256xf32>
    %24 = tpu.matmul %23, %22, %cst_19 {dimension_numbers = #tpu.dot_dimension_numbers<[1], [0], [0], [1], [0, 0, 1, 1], [], []>} : vector<48x8xbf16>, vector<8x256xbf16>, vector<48x256xf32> -> vector<48x256xf32>
    %25 = vector.extract_strided_slice %24 {offsets = [0, 0], sizes = [16, 256], strides = [1, 1]} : vector<48x256xf32> to vector<16x256xf32>
    %26 = vector.extract_strided_slice %24 {offsets = [16, 0], sizes = [16, 256], strides = [1, 1]} : vector<48x256xf32> to vector<16x256xf32>
    %27 = vector.extract_strided_slice %24 {offsets = [32, 0], sizes = [16, 256], strides = [1, 1]} : vector<48x256xf32> to vector<16x256xf32>
    %c1_i32 = arith.constant 1 : i32
    %28 = tpu.dynamic_rotate %25 by %c1_i32 dim 1 : vector<16x256xf32>, i32 -> vector<16x256xf32>
    %29 = vector.broadcast %0 : vector<1x256xf32> to vector<16x256xf32>
    %30 = arith.mulf %28, %29 : vector<16x256xf32>
    %31 = arith.addf %26, %30 : vector<16x256xf32>
    %c255_i32 = arith.constant 255 : i32
    %32 = tpu.dynamic_rotate %27 by %c255_i32 dim 1 : vector<16x256xf32>, i32 -> vector<16x256xf32>
    %33 = vector.broadcast %1 : vector<1x256xf32> to vector<16x256xf32>
    %34 = arith.mulf %32, %33 : vector<16x256xf32>
    %35 = arith.addf %31, %34 : vector<16x256xf32>
    %c0_20 = arith.constant 0 : index
    %c0_21 = arith.constant 0 : index
    %36 = vector.load %arg8[%c0_20, %c0_21] : memref<16x1xf32, #tpu.memory_space<vmem>>, vector<16x1xf32>
    %37 = vector.broadcast %36 : vector<16x1xf32> to vector<16x256xf32>
    %38 = arith.addf %35, %37 : vector<16x256xf32>
    %cst_22 = arith.constant 0.000000e+00 : f32
    %39 = vector.broadcast %cst_22 : f32 to vector<16x256xf32>
    %40 = arith.maximumf %38, %39 : vector<16x256xf32>
    %41 = arith.truncf %40 : vector<16x256xf32> to vector<16x256xbf16>
    %c0_23 = arith.constant 0 : index
    %c0_24 = arith.constant 0 : index
    %42 = vector.load %arg9[%c0_23, %c0_24] : memref<48x16xbf16, #tpu.memory_space<vmem>>, vector<48x16xbf16>
    %cst_25 = arith.constant dense<0.000000e+00> : vector<48x256xf32>
    %43 = tpu.matmul %42, %41, %cst_25 {dimension_numbers = #tpu.dot_dimension_numbers<[1], [0], [0], [1], [0, 0, 1, 1], [], []>} : vector<48x16xbf16>, vector<16x256xbf16>, vector<48x256xf32> -> vector<48x256xf32>
    %44 = vector.extract_strided_slice %43 {offsets = [0, 0], sizes = [16, 256], strides = [1, 1]} : vector<48x256xf32> to vector<16x256xf32>
    %45 = vector.extract_strided_slice %43 {offsets = [16, 0], sizes = [16, 256], strides = [1, 1]} : vector<48x256xf32> to vector<16x256xf32>
    %46 = vector.extract_strided_slice %43 {offsets = [32, 0], sizes = [16, 256], strides = [1, 1]} : vector<48x256xf32> to vector<16x256xf32>
    %c16_i32 = arith.constant 16 : i32
    %47 = tpu.dynamic_rotate %44 by %c16_i32 dim 1 : vector<16x256xf32>, i32 -> vector<16x256xf32>
    %48 = vector.broadcast %2 : vector<1x256xf32> to vector<16x256xf32>
    %49 = arith.mulf %47, %48 : vector<16x256xf32>
    %50 = arith.addf %45, %49 : vector<16x256xf32>
    %c240_i32 = arith.constant 240 : i32
    %51 = tpu.dynamic_rotate %46 by %c240_i32 dim 1 : vector<16x256xf32>, i32 -> vector<16x256xf32>
    %52 = vector.broadcast %3 : vector<1x256xf32> to vector<16x256xf32>
    %53 = arith.mulf %51, %52 : vector<16x256xf32>
    %54 = arith.addf %50, %53 : vector<16x256xf32>
    %c0_26 = arith.constant 0 : index
    %c0_27 = arith.constant 0 : index
    %55 = vector.load %arg10[%c0_26, %c0_27] : memref<16x1xf32, #tpu.memory_space<vmem>>, vector<16x1xf32>
    %56 = vector.broadcast %55 : vector<16x1xf32> to vector<16x256xf32>
    %57 = arith.addf %54, %56 : vector<16x256xf32>
    %cst_28 = arith.constant 0.000000e+00 : f32
    %58 = vector.broadcast %cst_28 : f32 to vector<16x256xf32>
    %59 = arith.maximumf %57, %58 : vector<16x256xf32>
    %60 = arith.truncf %59 : vector<16x256xf32> to vector<16x256xbf16>
    %c0_29 = arith.constant 0 : index
    %c0_30 = arith.constant 0 : index
    %61 = vector.load %arg11[%c0_29, %c0_30] : memref<32x16xbf16, #tpu.memory_space<vmem>>, vector<32x16xbf16>
    %cst_31 = arith.constant dense<0.000000e+00> : vector<32x256xf32>
    %62 = tpu.matmul %61, %60, %cst_31 {dimension_numbers = #tpu.dot_dimension_numbers<[1], [0], [0], [1], [0, 0, 1, 1], [], []>} : vector<32x16xbf16>, vector<16x256xbf16>, vector<32x256xf32> -> vector<32x256xf32>
    %c0_32 = arith.constant 0 : index
    %c0_33 = arith.constant 0 : index
    %63 = vector.load %arg12[%c0_32, %c0_33] : memref<32x1xf32, #tpu.memory_space<vmem>>, vector<32x1xf32>
    %64 = vector.broadcast %63 : vector<32x1xf32> to vector<32x256xf32>
    %65 = arith.addf %62, %64 : vector<32x256xf32>
    %cst_34 = arith.constant 0.000000e+00 : f32
    %66 = vector.broadcast %cst_34 : f32 to vector<32x256xf32>
    %67 = arith.maximumf %65, %66 : vector<32x256xf32>
    %68 = arith.extf %6 : vector<32x256xbf16> to vector<32x256xf32>
    %69 = arith.addf %67, %68 : vector<32x256xf32>
    %cst_35 = arith.constant 0.000000e+00 : f32
    %70 = vector.broadcast %cst_35 : f32 to vector<32x256xf32>
    %71 = arith.maximumf %69, %70 : vector<32x256xf32>
    %72 = arith.truncf %71 : vector<32x256xf32> to vector<32x256xbf16>
    %73 = arith.index_cast %c0_i32 : i32 to index
    %c0_36 = arith.constant 0 : index
    %c0_37 = arith.constant 0 : index
    %74 = vector.load %arg13[%73, %c0_36, %c0_37] : memref<1x32x256xbf16, #tpu.memory_space<vmem>>, vector<1x32x256xbf16>
    %75 = vector.shape_cast %74 : vector<1x32x256xbf16> to vector<32x256xbf16>
    %76 = vector.shape_cast %72 : vector<32x256xbf16> to vector<1x32x256xbf16>
    tpu.vector_store %arg13[%73, %c0_36, %c0_37], %76 {strides = array<i32>} : memref<1x32x256xbf16, #tpu.memory_space<vmem>>, vector<1x32x256xbf16>,
    %c1_i32_38 = arith.constant 1 : i32
    return
  }
  func.func @transform_0(%arg0: i32) -> (i32, i32) {
    %c0_i32 = arith.constant 0 : i32
    %c0_i32_0 = arith.constant 0 : i32
    %c0_i32_1 = arith.constant 0 : i32
    return %c0_i32, %c0_i32_0 : i32, i32
  }
  func.func @transform_1(%arg0: i32) -> (i32, i32, i32) {
    %c0_i32 = arith.constant 0 : i32
    %c0_i32_0 = arith.constant 0 : i32
    %c0_i32_1 = arith.constant 0 : i32
    return %arg0, %c0_i32, %c0_i32_0 : i32, i32, i32
  }
  func.func @transform_2(%arg0: i32) -> (i32, i32) {
    %c0_i32 = arith.constant 0 : i32
    %c0_i32_0 = arith.constant 0 : i32
    %c0_i32_1 = arith.constant 0 : i32
    return %c0_i32, %c0_i32_0 : i32, i32
  }
  func.func @transform_3(%arg0: i32) -> (i32, i32) {
    %c0_i32 = arith.constant 0 : i32
    %c0_i32_0 = arith.constant 0 : i32
    %c0_i32_1 = arith.constant 0 : i32
    return %c0_i32, %c0_i32_0 : i32, i32
  }
  func.func @transform_4(%arg0: i32) -> (i32, i32) {
    %c0_i32 = arith.constant 0 : i32
    %c0_i32_0 = arith.constant 0 : i32
    %c0_i32_1 = arith.constant 0 : i32
    return %c0_i32, %c0_i32_0 : i32, i32
  }
  func.func @transform_5(%arg0: i32) -> (i32, i32) {
    %c0_i32 = arith.constant 0 : i32
    %c0_i32_0 = arith.constant 0 : i32
    %c0_i32_1 = arith.constant 0 : i32
    return %c0_i32, %c0_i32_0 : i32, i32
  }
  func.func @transform_6(%arg0: i32) -> (i32, i32) {
    %c0_i32 = arith.constant 0 : i32
    %c0_i32_0 = arith.constant 0 : i32
    %c0_i32_1 = arith.constant 0 : i32
    return %c0_i32, %c0_i32_0 : i32, i32
  }
  func.func @transform_7(%arg0: i32) -> (i32, i32) {
    %c0_i32 = arith.constant 0 : i32
    %c0_i32_0 = arith.constant 0 : i32
    %c0_i32_1 = arith.constant 0 : i32
    return %c0_i32, %c0_i32_0 : i32, i32
  }
  func.func @transform_8(%arg0: i32) -> (i32, i32) {
    %c0_i32 = arith.constant 0 : i32
    %c0_i32_0 = arith.constant 0 : i32
    %c0_i32_1 = arith.constant 0 : i32
    return %c0_i32, %c0_i32_0 : i32, i32
  }
  func.func @transform_9(%arg0: i32) -> (i32, i32) {
    %c0_i32 = arith.constant 0 : i32
    %c0_i32_0 = arith.constant 0 : i32
    %c0_i32_1 = arith.constant 0 : i32
    return %c0_i32, %c0_i32_0 : i32, i32
  }
  func.func @transform_10(%arg0: i32) -> (i32, i32) {
    %c0_i32 = arith.constant 0 : i32
    %c0_i32_0 = arith.constant 0 : i32
    %c0_i32_1 = arith.constant 0 : i32
    return %c0_i32, %c0_i32_0 : i32, i32
  }
  func.func @transform_11(%arg0: i32) -> (i32, i32) {
    %c0_i32 = arith.constant 0 : i32
    %c0_i32_0 = arith.constant 0 : i32
    %c0_i32_1 = arith.constant 0 : i32
    return %c0_i32, %c0_i32_0 : i32, i32
  }
  func.func @transform_12(%arg0: i32) -> (i32, i32, i32) {
    %c0_i32 = arith.constant 0 : i32
    %c0_i32_0 = arith.constant 0 : i32
    %c0_i32_1 = arith.constant 0 : i32
    return %arg0, %c0_i32, %c0_i32_0 : i32, i32, i32
  }
}

</mosaic_0001>

<bundles_post_ra>
// kernel: sqnxt_unit.1
= control target key start
LH: loop header
LB: loop body
LE: loop exit
PB: predicated region body
PF: predicated region fallthrough
CT: control target
= control target key end

     0   :  { %s1308_s21 = smov 0   ;;  %s1489_s0 = inlined_call_operand.vmem [shape: f32[4,256], index: 0, kind: input, shape index: {}]   ;;  %s1490_s1 = inlined_call_operand.vmem [shape: bf16[2,32,256], index: 1, kind: input, shape index: {}]   ;;  %s1491_s2 = inlined_call_operand.vmem [shape: bf16[16,32], index: 2, kind: input, shape index: {}]   ;;  %s1492_s3 = inlined_call_operand.vmem [shape: f32[16,1], index: 3, kind: input, shape index: {}]   ;;  %s1493_s4 = inlined_call_operand.vmem [shape: bf16[8,16], index: 4, kind: input, shape index: {}]   ;;  %s1494_s5 = inlined_call_operand.vmem [shape: f32[8,1], index: 5, kind: input, shape index: {}]   ;;  %s1495_s6 = inlined_call_operand.vmem [shape: bf16[48,8], index: 6, kind: input, shape index: {}]   ;;  %s1496_s7 = inlined_call_operand.vmem [shape: f32[16,1], index: 7, kind: input, shape index: {}]   ;;  %s1497_s8 = inlined_call_operand.vmem [shape: bf16[48,16], index: 8, kind: input, shape index: {}]   ;;  %s1498_s9 = inlined_call_operand.vmem [shape: f32[16,1], index: 9, kind: input, shape index: {}]   ;;  %s1499_s10 = inlined_call_operand.vmem [shape: bf16[32,16], index: 10, kind: input, shape index: {}]   ;;  %s1500_s11 = inlined_call_operand.vmem [shape: f32[32,1], index: 11, kind: input, shape index: {}]   ;;  %s1501_s12 = inlined_call_operand.vmem [shape: bf16[2,32,256], index: 12, kind: output, shape index: {}]  }
   0x1 LB: > { %s1154_s22 = sadd.s32 4294967295, %s1236_s21   ;;  %p1158_p0 = scmp.ge.s32.totalorder %s1236_s21, 1  ;;  %s1236_s21 = sphi %s1308_s21, %s22_s21  }
   0x2   : > { %p362_p1 = scmp.lt.s32.totalorder %s1236_s21, 3 }
   0x4   : > { %p363_p2 = pnand %p1158_p0, %p362_p1 }
   0x5   : > { %p404_p3 = scmp.lt.s32.totalorder (!%p363_p2), %s1154_s22, 1  ;;  %v1238_v0 = vmov (!%p363_p2), 0   ;;  %v428_v1 = vld [vmem:[%s1492_s3] sm:$0xff] (!%p363_p2)  ;;  %v429_v2 = vld [vmem:[%s1492_s3 + $0x8] sm:$0xff] (!%p363_p2)  ;;  %vm465_vm0 = vcmask (!%p363_p2), 261120   ;;  %vm525_vm1 = vcmask (!%p363_p2), 130048   ;;  %v683_v62 = vlaneseq (!%p363_p2) }
   0x6   : > { %366 = sbr.rel (%p363_p2) target bundleno = 1437 (0x59d), region = 68  ;;  %501 = vmatprep.mubr.bf16.mxu0 (!%p363_p2), %v1238_v0  ;;  %1215 = vset.pattern.permute.xlu0 (!%p363_p2), %v1238_v0  ;;  %v742_v3 = vld [vmem:[%s1496_s7 + $0x8] sm:$0xff] (!%p363_p2)  ;;  %v1221_v12 = vld [vmem:[%s1491_s2] sm:$0xff] (!%p363_p2)   ;;  %vm605_vm2 = vcmask (!%p363_p2), 1043456   ;;  %vm595_vm3 = vcmask (!%p363_p2), 64512   ;;  %v1224_v46 = vld [vmem:[%s1495_s6 + $0x10] sm:$0xff] (!%p363_p2)  }
   0x7   : > { %432 = vperm.xlu0 (!%p363_p2), %1215, %v428_v1   ;;  %1216 = vset.pattern.permute.xlu1 (!%p363_p2), %v1238_v0  ;;  %v519_v13 = vld [vmem:[%s1494_s5] sm:$0xff] (!%p363_p2)  ;;  %v1223_v45 = vld [vmem:[%s1495_s6 + $0x8] sm:$0xff] (!%p363_p2)   ;;  %s1239_s14 = smov (!%p363_p2), 1   ;;  %s1240_s15 = smov (!%p363_p2), 127  }
   0x8   : > { %644 = vmatprep.mubr.bf16.mxu1 (!%p363_p2), %v1238_v0  ;;  %522 = vperm.xlu1 (!%p363_p2), %1216, %v519_v13   ;;  %v741_v14 = vld [vmem:[%s1496_s7] sm:$0xff] (!%p363_p2)  ;;  %v921_v60 = vld [vmem:[%s1498_s9 + $0x8] sm:$0xff] (!%p363_p2)  ;;  %s1242_s16 = smov (!%p363_p2), 112  }
   0x9   : > { %v518_v31 = vld [vmem:[%s1493_s4] sm:$0xf] (!%p363_p2) }
   0xa   : > { %v1222_v44 = vld [vmem:[%s1495_s6] sm:$0xff] (!%p363_p2)  }
   0xb   : > { %437 = vperm.xlu0 (!%p363_p2), %1215, %v429_v2   ;;  %v920_v59 = vld [vmem:[%s1498_s9] sm:$0xff] (!%p363_p2)  ;;  %v692_v2 = vshrl.u32 (!%p363_p2), %v683_v62, 7 }
   0xc   : > { %745 = vperm.xlu1 (!%p363_p2), %1216, %v741_v14  }
   0xd   : > { %s1503_s22 = smov (!%p404_p3, %s1154_s22), 1 }
   0xe   : > { %s1196_s27 = sshll.u32 %s1503_s22, 5 }
   0xf   : > { %s408_s30 = scalar_lea.vmem %s1490_s1, %s1196_s27  ;;  %750 = vperm.xlu0 %1215, %v742_v3   ;;  %s1476_s20 = scalar_lea.vmem %s1501_s12, %s1196_s27 }
  0x10   : > { %v1337_v4 = vld [vmem:[%s408_s30] sm:$0xff]  ;;  %v1339_v5 = vld [vmem:[%s408_s30 + $0x8] sm:$0xff]  ;;  %v1341_v6 = vld [vmem:[%s408_s30 + $0x10] sm:$0xff] }
  0x11   : > { %v1168_v7 = vcombine.high %v1337_v4, %v1339_v5  ;;  %v1167_v8 = vcombine.low %v1337_v4, %v1339_v5  ;;  %v1347_v9 = vld [vmem:[%s408_s30 + $0x18] sm:$0xff] }
  0x12   : > { %v1170_v10 = vcombine.high %v1341_v6, %v1347_v9  ;;  %v1169_v11 = vcombine.low %v1341_v6, %v1347_v9 }
  0x13   : > { %469 = vmatprep.subr.bf16.mxu0 %v1168_v7  ;;  %v1386_v7 = vand.u32 127, %v683_v62 }
  0x14   : > { %470 = vmatpush1.bf16.msra.mxu0 %v1167_v8  ;;  %v1388_v8 = vsub.s32 0, %v692_v2 }
  0x15   : > { %471 = vmatprep.subr.bf16.mxu0 %v1170_v10  ;;  %v1390_v10 = vsub.s32 1, %v692_v2  ;;  %vm685_vm4 = vcmp.lt.s32.totalorder %v1386_v7, 1  ;;  %vm717_vm5 = vcmp.lt.s32.totalorder %v1386_v7, 127  ;;  %vm864_vm6 = vcmp.lt.s32.totalorder %v1386_v7, 16 }
  0x16   : > { %vm896_vm7 = vcmp.lt.s32.totalorder %v1386_v7, 112  ;;  %v1228_v7 = vld [vmem:[%s1499_s10] sm:$0xff]  }
  0x18   : > { %472 = vmatpush1.bf16.msra.mxu0 %v1169_v11  ;;  %v415_v11 = vld [vmem:[%s1489_s0] ss:$4 sm:$0x3] }
  0x19   : > { %v694_v14 = vrot.slane %v415_v11, %v1388_v8 }
  0x1b   : > { %1171 = vmatmul.mubr.msk.bf16.vlgmr.msra.gmra.mrb[0].mxu0 %vm465_vm0, %v1221_v12 }
  0x1c   : > { %561 = vmatprep.mubr.bf16.mxu0 %v1238_v0 }
  0x86   : > { %v433_v15 = vpop.permute.xlu0 %432 }
  0x87   : > { %v523_v32 = vpop.permute.xlu1 %522 }
  0x8a   : > { %v438_v19 = vpop.permute.xlu0 %437 }
  0x8b   : > { %v746_v61 = vpop.permute.xlu1 %745 }
  0x8e   : > { %v751_v63 = vpop.permute.xlu0 %750 }
  0xee   : > { %v503_v16 = vpop.f32.mrb[0].mxu0 }
  0xef   : > { %v504_v17 = vadd.f32 %v503_v16, %v433_v15  ;;  %v505_v18 = vpop.f32.mrb[1].mxu0 }
  0xf0   : > { %v506_v20 = vadd.f32 %v505_v18, %v433_v15  ;;  %v507_v21 = vpop.f32.mrb[2].mxu0  ;;  %v698_v15 = vrot.slane %v415_v11, %v1390_v10  ;;  %v1163_v18 = vld [vmem:[%s1489_s0 + $0x1] ss:$4 sm:$0x3] }
  0xf1   : > { %v508_v22 = vadd.f32 %v507_v21, %v438_v19  ;;  %v509_v23 = vpop.f32.mrb[3].mxu0  ;;  %v512_v25 = vmax.f32 %v504_v17, 0.0 }
  0xf2   : > { %v510_v24 = vadd.f32 %v509_v23, %v438_v19  ;;  %v513_v27 = vmax.f32 %v506_v20, 0.0 }
  0xf3   : > { %v514_v26 = vmax.f32 %v508_v22, 0.0 }
  0xf4   : > { %v515_v28 = vmax.f32 %v510_v24, 0.0 }
  0xf5   : > { %v516_v29 = vpack.c.bf16 %v514_v26, %v512_v25  ;;  %v726_v25 = vrot.slane %v1163_v18, %v1388_v8  ;;  %v730_v26 = vrot.slane %v1163_v18, %v1390_v10  ;;  %v948_v18 = vld [vmem:[%s1500_s11 + $0x10] sm:$0xff] }
  0xf6   : > { %v517_v30 = vpack.c.bf16 %v515_v28, %v513_v27 }
  0xf8   : > { %529 = vmatprep.subr.bf16.mxu0 %v517_v30 }
  0xf9   : > { %530 = vmatpush1.bf16.msra.mxu0 %v516_v29 }
  0xfc   : > { %1172 = vmatmul.mubr.msk.bf16.vlgmr.msra.gmra.mrb[4].mxu0 %vm525_vm1, %v518_v31 }
  0xfd   : > { %825 = vmatprep.mubr.bf16.mxu0 %v1238_v0 }
 0x1cf   : > { %v563_v33 = vpop.f32.mrb[4].mxu0 }
 0x1d0   : > { %v564_v34 = vadd.f32 %v563_v33, %v523_v32  ;;  %v565_v35 = vpop.f32.mrb[5].mxu0 }
 0x1d1   : > { %v566_v36 = vadd.f32 %v565_v35, %v523_v32  ;;  %v567_v37 = vpop.f32.mrb[6].mxu0 }
 0x1d2   : > { %v570_v38 = vmax.f32 %v564_v34, 0.0  ;;  %v568_v39 = vpop.f32.mrb[7].mxu0 }
 0x1d3   : > { %v571_v40 = vmax.f32 %v566_v36, 0.0 }
 0x1d4   : > { %v572_v41 = vpack.c.bf16 %v570_v38, %v570_v38 }
 0x1d5   : > { %v573_v42 = vpack.c.bf16 %v571_v40, %v571_v40 }
 0x1d6   : > { %v607_v43 = vsel %vm605_vm2, %v572_v41, 0 }
 0x1d7   : > { %1176 = vmatprep.subr.msk.bf16.mxu1 %vm605_vm2, %v573_v42 }
 0x1d8   : > { %613 = vmatpush1.bf16.msra.mxu1 %v607_v43 }
 0x1db   : > { %1177 = vmatmul.mubr.msk.bf16.vlgmr.msra.gmra.mrb[0].mxu1 %vm595_vm3, %v1222_v44 }
 0x1dc   : > { %654 = vmatprep.mubr.bf16.mxu1 %v1238_v0 }
 0x1e3   : > { %1178 = vmatmul.mubr.msk.bf16.gmra.mrb[4].mxu1 %vm595_vm3, %v1223_v45 }
 0x1e4   : > { %664 = vmatprep.mubr.bf16.mxu1 %v1238_v0 }
 0x1eb   : > { %1179 = vmatmul.mubr.msk.bf16.gmra.mrb[8].mxu1 %vm595_vm3, %v1224_v46 }
 0x1ec   : > { %1018 = vmatprep.mubr.bf16.mxu1 %v1238_v0 }
 0x2ae   : > { %v646_v47 = vpop.f32.mrb[0].mxu1 }
 0x2af   : > { %675 = vrot.lane.b32.xlu1 %v646_v47, %s1239_s14  ;;  %v648_v48 = vpop.f32.mrb[1].mxu1 }
 0x2b0   : > { %v650_v49 = vpop.f32.mrb[2].mxu1 }
 0x2b1   : > { %677 = vrot.lane.b32.xlu0 %v650_v49, %s1239_s14  ;;  %v652_v50 = vpop.f32.mrb[3].mxu1 }
 0x2b3   : > { %679 = vrot.lane.b32.xlu1 %v648_v48, %s1239_s14 }
 0x2b5   : > { %681 = vrot.lane.b32.xlu0 %v652_v50, %s1239_s14 }
 0x2b6   : > { %v656_v51 = vpop.f32.mrb[4].mxu1 }
 0x2b7   : > { %v658_v52 = vpop.f32.mrb[5].mxu1 }
 0x2b8   : > { %v660_v53 = vpop.f32.mrb[6].mxu1 }
 0x2b9   : > { %v662_v54 = vpop.f32.mrb[7].mxu1 }
 0x2be   : > { %v666_v55 = vpop.f32.mrb[8].mxu1 }
 0x2bf   : > { %709 = vrot.lane.b32.xlu1 %v666_v55, %s1240_s15  ;;  %v668_v56 = vpop.f32.mrb[9].mxu1 }
 0x2c0   : > { %v670_v57 = vpop.f32.mrb[10].mxu1 }
 0x2c1   : > { %711 = vrot.lane.b32.xlu0 %v670_v57, %s1240_s15  ;;  %v672_v58 = vpop.f32.mrb[11].mxu1  ;;  %v1225_v57 = vld [vmem:[%s1497_s8] sm:$0xff]  }
 0x2c3   : > { %713 = vrot.lane.b32.xlu1 %v668_v56, %s1240_s15 }
 0x2c5   : > { %715 = vrot.lane.b32.xlu0 %v672_v58, %s1240_s15  ;;  %v1226_v58 = vld [vmem:[%s1497_s8 + $0x8] sm:$0xff]   ;;  %s1241_s15 = smov 16  }
 0x2c7   : > { %924 = vperm.xlu1 %1216, %v920_v59   ;;  %v1227_v59 = vld [vmem:[%s1497_s8 + $0x10] sm:$0xff]  }
 0x2c9   : > { %929 = vperm.xlu0 %1215, %v921_v60  }
 0x321   : > { %v676_v1 = vpop.permute.xlu1 %675 }
 0x323   : > { %v678_v3 = vpop.permute.xlu0 %677 }
 0x325   : > { %v680_v12 = vpop.permute.xlu1 %679 }
 0x326   : > { %v686_v16 = vsel %vm685_vm4, %v676_v1, %v680_v12  ;;  %v688_v17 = vsel %vm685_vm4, %v680_v12, %v676_v1 }
 0x327   : > { %v682_v13 = vpop.permute.xlu0 %681  ;;  %v701_v22 = vmul.f32 %v694_v14, %v688_v17  ;;  %v702_v23 = vmul.f32 %v698_v15, %v686_v16  ;;  %v946_v16 = vld [vmem:[%s1500_s11] sm:$0xff]  ;;  %v947_v17 = vld [vmem:[%s1500_s11 + $0x8] sm:$0xff] }
 0x328   : > { %v687_v19 = vsel %vm685_vm4, %v678_v3, %v682_v13  ;;  %v689_v20 = vsel %vm685_vm4, %v682_v13, %v678_v3 }
 0x329   : > { %v703_v27 = vmul.f32 %v694_v14, %v689_v20  ;;  %v704_v28 = vmul.f32 %v698_v15, %v687_v19  ;;  %v705_v32 = vadd.f32 %v701_v22, %v656_v51  ;;  %v706_v33 = vadd.f32 %v702_v23, %v658_v52  ;;  %v949_v19 = vld [vmem:[%s1500_s11 + $0x18] sm:$0xff] }
 0x32b   : > { %v707_v37 = vadd.f32 %v703_v27, %v660_v53  ;;  %v708_v38 = vadd.f32 %v704_v28, %v662_v54 }
 0x331   : > { %v710_v21 = vpop.permute.xlu1 %709 }
 0x333   : > { %v712_v24 = vpop.permute.xlu0 %711 }
 0x335   : > { %v714_v29 = vpop.permute.xlu1 %713 }
 0x336   : > { %v718_v30 = vsel %vm717_vm5, %v710_v21, %v714_v29  ;;  %v720_v31 = vsel %vm717_vm5, %v714_v29, %v710_v21 }
 0x337   : > { %v733_v34 = vmul.f32 %v726_v25, %v718_v30  ;;  %v734_v35 = vmul.f32 %v730_v26, %v720_v31  ;;  %v716_v36 = vpop.permute.xlu0 %715  ;;  %v1165_v31 = vld [vmem:[%s1489_s0 + $0x3] ss:$4 sm:$0x3] }
 0x338   : > { %v719_v39 = vsel %vm717_vm5, %v712_v24, %v716_v36  ;;  %v721_v40 = vsel %vm717_vm5, %v716_v36, %v712_v24  ;;  %v1164_v24 = vld [vmem:[%s1489_s0 + $0x2] ss:$4 sm:$0x3] }
 0x339   : > { %v737_v41 = vadd.f32 %v733_v34, %v705_v32  ;;  %v738_v42 = vadd.f32 %v734_v35, %v706_v33  ;;  %v735_v43 = vmul.f32 %v726_v25, %v719_v39  ;;  %v736_v44 = vmul.f32 %v730_v26, %v721_v40 }
 0x33a   : > { %v873_v27 = vrot.slane %v1164_v24, %v1388_v8  ;;  %v877_v28 = vrot.slane %v1164_v24, %v1390_v10  ;;  %v909_v39 = vrot.slane %v1165_v31, %v1390_v10 }
 0x33b   : > { %v753_v45 = vadd.f32 %v746_v61, %v737_v41  ;;  %v739_v46 = vadd.f32 %v735_v43, %v707_v37  ;;  %v740_v47 = vadd.f32 %v736_v44, %v708_v38  ;;  %v754_v48 = vadd.f32 %v746_v61, %v738_v42 }
 0x33c   : > { %v905_v38 = vrot.slane %v1165_v31, %v1388_v8 }
 0x33d   : > { %v755_v49 = vadd.f32 %v751_v63, %v739_v46  ;;  %v756_v50 = vadd.f32 %v751_v63, %v740_v47  ;;  %v757_v51 = vmax.f32 %v753_v45, 0.0  ;;  %v758_v53 = vmax.f32 %v754_v48, 0.0 }
 0x33f   : > { %v759_v52 = vmax.f32 %v755_v49, 0.0  ;;  %v760_v54 = vmax.f32 %v756_v50, 0.0 }
 0x341   : > { %v762_v55 = vpack.c.bf16 %v760_v54, %v758_v53  ;;  %v761_v56 = vpack.c.bf16 %v759_v52, %v757_v51 }
 0x343   : > { %793 = vmatprep.subr.bf16.mxu0 %v762_v55 }
 0x344   : > { %794 = vmatpush1.bf16.msra.mxu0 %v761_v56 }
 0x346   : > { %v925_v20 = vpop.permute.xlu1 %924 }
 0x347   : > { %1183 = vmatmul.mubr.msk.bf16.vlgmr.msra.gmra.mrb[8].mxu0 %vm525_vm1, %v1225_v57 }
 0x348   : > { %835 = vmatprep.mubr.bf16.mxu0 %v1238_v0  ;;  %v930_v21 = vpop.permute.xlu0 %929 }
 0x34f   : > { %1184 = vmatmul.mubr.msk.bf16.gmra.mrb[12].mxu0 %vm525_vm1, %v1226_v58 }
 0x350   : > { %845 = vmatprep.mubr.bf16.mxu0 %v1238_v0 }
 0x357   : > { %1185 = vmatmul.mubr.msk.bf16.gmra.mrb[16].mxu0 %vm525_vm1, %v1227_v59 }
 0x41a   : > { %v827_v60 = vpop.f32.mrb[8].mxu0 }
 0x41b   : > { %856 = vrot.lane.b32.xlu1 %v827_v60, %s1241_s15  ;;  %v829_v61 = vpop.f32.mrb[9].mxu0 }
 0x41c   : > { %v831_v62 = vpop.f32.mrb[10].mxu0 }
 0x41d   : > { %858 = vrot.lane.b32.xlu0 %v831_v62, %s1241_s15  ;;  %v833_v63 = vpop.f32.mrb[11].mxu0 }
 0x41f   : > { %860 = vrot.lane.b32.xlu1 %v829_v61, %s1241_s15 }
 0x421   : > { %862 = vrot.lane.b32.xlu0 %v833_v63, %s1241_s15 }
 0x422   : > { %v837_v1 = vpop.f32.mrb[12].mxu0 }
 0x423   : > { %v839_v2 = vpop.f32.mrb[13].mxu0 }
 0x424   : > { %v841_v3 = vpop.f32.mrb[14].mxu0 }
 0x425   : > { %v843_v11 = vpop.f32.mrb[15].mxu0 }
 0x42a   : > { %v847_v12 = vpop.f32.mrb[16].mxu0 }
 0x42b   : > { %888 = vrot.lane.b32.xlu1 %v847_v12, %s1242_s16  ;;  %v849_v13 = vpop.f32.mrb[17].mxu0  ;;  %v1229_v12 = vld [vmem:[%s1499_s10 + $0x8] sm:$0xff]  }
 0x42c   : > { %v851_v14 = vpop.f32.mrb[18].mxu0 }
 0x42d   : > { %890 = vrot.lane.b32.xlu0 %v851_v14, %s1242_s16  ;;  %v853_v15 = vpop.f32.mrb[19].mxu0 }
 0x42f   : > { %892 = vrot.lane.b32.xlu1 %v849_v13, %s1242_s16 }
 0x431   : > { %894 = vrot.lane.b32.xlu0 %v853_v15, %s1242_s16 }
 0x433   : > { %952 = vperm.xlu1 %1216, %v946_v16   ;;  %v1047_v16 = vunpack.c.l.bf16 %v1337_v4 }
 0x435   : > { %957 = vperm.xlu0 %1215, %v947_v17  }
 0x437   : > { %962 = vperm.xlu1 %1216, %v948_v18  }
 0x439   : > { %967 = vperm.xlu0 %1215, %v949_v19  }
 0x48d   : > { %v857_v22 = vpop.permute.xlu1 %856 }
 0x48f   : > { %v859_v23 = vpop.permute.xlu0 %858 }
 0x491   : > { %v861_v25 = vpop.permute.xlu1 %860 }
 0x492   : > { %v865_v29 = vsel %vm864_vm6, %v857_v22, %v861_v25  ;;  %v867_v30 = vsel %vm864_vm6, %v861_v25, %v857_v22 }
 0x493   : > { %v863_v26 = vpop.permute.xlu0 %862  ;;  %v880_v35 = vmul.f32 %v873_v27, %v867_v30  ;;  %v881_v36 = vmul.f32 %v877_v28, %v865_v29 }
 0x494   : > { %v866_v32 = vsel %vm864_vm6, %v859_v23, %v863_v26  ;;  %v868_v33 = vsel %vm864_vm6, %v863_v26, %v859_v23 }
 0x495   : > { %v882_v40 = vmul.f32 %v873_v27, %v868_v33  ;;  %v883_v41 = vmul.f32 %v877_v28, %v866_v32  ;;  %v884_v45 = vadd.f32 %v880_v35, %v837_v1  ;;  %v885_v46 = vadd.f32 %v881_v36, %v839_v2 }
 0x496   : > { %v1050_v27 = vunpack.c.h.bf16 %v1339_v5 }
 0x497   : > { %v886_v50 = vadd.f32 %v882_v40, %v841_v3  ;;  %v887_v51 = vadd.f32 %v883_v41, %v843_v11 }
 0x49d   : > { %v889_v34 = vpop.permute.xlu1 %888 }
 0x49f   : > { %v891_v37 = vpop.permute.xlu0 %890 }
 0x4a1   : > { %v893_v42 = vpop.permute.xlu1 %892 }
 0x4a2   : > { %v897_v43 = vsel %vm896_vm7, %v889_v34, %v893_v42  ;;  %v899_v44 = vsel %vm896_vm7, %v893_v42, %v889_v34 }
 0x4a3   : > { %v912_v47 = vmul.f32 %v905_v38, %v897_v43  ;;  %v913_v48 = vmul.f32 %v909_v39, %v899_v44  ;;  %v895_v49 = vpop.permute.xlu0 %894  ;;  %v1052_v44 = vunpack.c.h.bf16 %v1341_v6 }
 0x4a4   : > { %v898_v8 = vsel %vm896_vm7, %v891_v37, %v895_v49  ;;  %v900_v10 = vsel %vm896_vm7, %v895_v49, %v891_v37 }
 0x4a5   : > { %v916_v52 = vadd.f32 %v912_v47, %v884_v45  ;;  %v917_v53 = vadd.f32 %v913_v48, %v885_v46  ;;  %v914_v54 = vmul.f32 %v905_v38, %v898_v8  ;;  %v915_v55 = vmul.f32 %v909_v39, %v900_v10 }
 0x4a6   : > { %v1053_v48 = vunpack.c.l.bf16 %v1347_v9  ;;  %v1054_v10 = vunpack.c.h.bf16 %v1347_v9 }
 0x4a7   : > { %v932_v56 = vadd.f32 %v925_v20, %v916_v52  ;;  %v918_v57 = vadd.f32 %v914_v54, %v886_v50  ;;  %v919_v58 = vadd.f32 %v915_v55, %v887_v51  ;;  %v933_v59 = vadd.f32 %v925_v20, %v917_v53 }
 0x4a8   : > { %v1048_v20 = vunpack.c.h.bf16 %v1337_v4 }
 0x4a9   : > { %v934_v60 = vadd.f32 %v930_v21, %v918_v57  ;;  %v935_v61 = vadd.f32 %v930_v21, %v919_v58  ;;  %v936_v62 = vmax.f32 %v932_v56, 0.0  ;;  %v937_v1 = vmax.f32 %v933_v59, 0.0 }
 0x4ab   : > { %v938_v63 = vmax.f32 %v934_v60, 0.0  ;;  %v939_v2 = vmax.f32 %v935_v61, 0.0 }
 0x4ad   : > { %v941_v3 = vpack.c.bf16 %v939_v2, %v937_v1  ;;  %v940_v11 = vpack.c.bf16 %v938_v63, %v936_v62 }
 0x4af   : > { %986 = vmatprep.subr.bf16.mxu1 %v941_v3 }
 0x4b0   : > { %987 = vmatpush1.bf16.msra.mxu1 %v940_v11 }
 0x4b2   : > { %v953_v13 = vpop.permute.xlu1 %952 }
 0x4b3   : > { %1188 = vmatmul.mubr.msk.bf16.vlgmr.msra.gmra.mrb[12].mxu1 %vm525_vm1, %v1228_v7 }
 0x4b4   : > { %1028 = vmatprep.mubr.bf16.mxu1 %v1238_v0  ;;  %v958_v18 = vpop.permute.xlu0 %957  ;;  %v1049_v0 = vunpack.c.l.bf16 %v1339_v5  ;;  %v1051_v5 = vunpack.c.l.bf16 %v1341_v6 }
 0x4b6   : > { %v963_v34 = vpop.permute.xlu1 %962 }
 0x4b8   : > { %v968_v40 = vpop.permute.xlu0 %967 }
 0x4bb   : > { %1189 = vmatmul.mubr.msk.bf16.gmra.mrb[16].mxu1 %vm525_vm1, %v1229_v12 }
 0x586   : > { %v1020_v14 = vpop.f32.mrb[12].mxu1 }
 0x587   : > { %v1021_v15 = vadd.f32 %v1020_v14, %v953_v13  ;;  %v1022_v17 = vpop.f32.mrb[13].mxu1 }
 0x588   : > { %v1023_v19 = vadd.f32 %v1022_v17, %v953_v13  ;;  %v1024_v21 = vpop.f32.mrb[14].mxu1 }
 0x589   : > { %v1039_v22 = vmax.f32 %v1021_v15, 0.0  ;;  %v1025_v23 = vadd.f32 %v1024_v21, %v958_v18  ;;  %v1026_v24 = vpop.f32.mrb[15].mxu1 }
 0x58a   : > { %v1040_v25 = vmax.f32 %v1023_v19, 0.0  ;;  %v1027_v26 = vadd.f32 %v1026_v24, %v958_v18 }
 0x58b   : > { %v1055_v28 = vadd.f32 %v1047_v16, %v1039_v22  ;;  %v1041_v29 = vmax.f32 %v1025_v23, 0.0 }
 0x58c   : > { %v1056_v30 = vadd.f32 %v1048_v20, %v1040_v25  ;;  %v1042_v31 = vmax.f32 %v1027_v26, 0.0 }
 0x58d   : > { %v1063_v32 = vmax.f32 %v1055_v28, 0.0  ;;  %v1057_v33 = vadd.f32 %v1049_v0, %v1041_v29 }
 0x58e   : > { %v1064_v35 = vmax.f32 %v1056_v30, 0.0  ;;  %v1058_v4 = vadd.f32 %v1050_v27, %v1042_v31  ;;  %v1030_v36 = vpop.f32.mrb[16].mxu1 }
 0x58f   : > { %v1065_v37 = vmax.f32 %v1057_v33, 0.0  ;;  %v1031_v38 = vadd.f32 %v1030_v36, %v963_v34  ;;  %v1032_v39 = vpop.f32.mrb[17].mxu1 }
 0x590   : > { %v1198_v41 = vpack.c.bf16 %v1064_v35, %v1063_v32  ;;  %v1066_v42 = vmax.f32 %v1058_v4, 0.0  ;;  %v1033_v43 = vadd.f32 %v1032_v39, %v963_v34  ;;  %v1034_v45 = vpop.f32.mrb[18].mxu1 }
 0x591   : > { %v1043_v46 = vmax.f32 %v1031_v38, 0.0  ;;  %v1035_v47 = vadd.f32 %v1034_v45, %v968_v40  ;;  %v1036_v49 = vpop.f32.mrb[19].mxu1 }
 0x592   : > { %1095 = vst [vmem:[%s1476_s20] sm:$0xff] %v1198_v41  ;;  %v1199_v50 = vpack.c.bf16 %v1066_v42, %v1065_v37  ;;  %v1044_v51 = vmax.f32 %v1033_v43, 0.0  ;;  %v1037_v8 = vadd.f32 %v1036_v49, %v968_v40 }
 0x593   : > { %v1059_v52 = vadd.f32 %v1051_v5, %v1043_v46  ;;  %v1045_v53 = vmax.f32 %v1035_v47, 0.0 }
 0x594   : > { %1096 = vst [vmem:[%s1476_s20 + $0x8] sm:$0xff] %v1199_v50  ;;  %v1060_v54 = vadd.f32 %v1052_v44, %v1044_v51  ;;  %v1046_v55 = vmax.f32 %v1037_v8, 0.0 }
 0x595   : > { %v1067_v6 = vmax.f32 %v1059_v52, 0.0  ;;  %v1061_v56 = vadd.f32 %v1053_v48, %v1045_v53 }
 0x596   : > { %v1068_v57 = vmax.f32 %v1060_v54, 0.0  ;;  %v1062_v58 = vadd.f32 %v1054_v10, %v1046_v55 }
 0x597   : > { %v1069_v59 = vmax.f32 %v1061_v56, 0.0 }
 0x598   : > { %v1200_v60 = vpack.c.bf16 %v1068_v57, %v1067_v6  ;;  %v1070_v61 = vmax.f32 %v1062_v58, 0.0 }
 0x59a   : > { %1097 = vst [vmem:[%s1476_s20 + $0x10] sm:$0xff] %v1200_v60  ;;  %v1201_v62 = vpack.c.bf16 %v1070_v61, %v1069_v59 }
 0x59c   : > { %1098 = vst [vmem:[%s1476_s20 + $0x18] sm:$0xff] %v1201_v62 }
 0x59d PF: > { %s22_s21 = sadd.s32 1, %s1236_s21  }
 0x59e   : > { %p19_p4 = scmp.ge.s32.totalorder %s22_s21, 4  }
 0x5a0   :  { %21 = sbr.rel (!%p19_p4) target bundleno = 1 (0x1), region = 101 }

</bundles_post_ra>
